<compile_context>
chip_gen: v7x
topology: tpu7x:2x2x1
jax: 0.10.0
libtpu: 0.0.40
codegen_flags: <defaults>
</compile_context>

<pallas_src>
import functools

import numpy as np
import jax
import jax.numpy as jnp
from jax import lax
from jax.experimental import pallas as pl
from jax.experimental.pallas import tpu as pltpu

NEG_SLOPE = 0.2
INV_SQRT2 = np.float32(1.0 / np.sqrt(2.0))

# 3x3 tap enumeration; tap index t = (dh+1)*3 + (dw+1) == kh*3 + kw.
_TAPS = [(dh, dw) for dh in (-1, 0, 1) for dw in (-1, 0, 1)]
_CENTER = _TAPS.index((0, 0))                                   # == 4
_OFFCENTER = [(t, dh, dw) for t, (dh, dw) in enumerate(_TAPS)
              if (dh, dw) != (0, 0)]                            # 8 taps


def _leaky(x):
    return jnp.where(x > 0, x, NEG_SLOPE * x)


def downconv_kernel(x_ref, w1_ref, b1_ref, w2_ref, b2_ref, wsk_ref, masks_ref,
                    out_ref, *, W):
    """Whole batch in one step; channel-major (C, N) with N = B*H*W on lanes.

    x_ref     : (Cin,  N)        raw input, batch folded onto the lane axis
    w1_ref    : (9, Cout, Cin)   conv1 taps, tap-major (t = kh*3 + kw)
    b1_ref    : (Cout, N)        conv1 bias + dense_t1(t_emb), per-batch lane map
    w2_ref    : (9, Cout, Cout)  conv2 taps
    b2_ref    : (Cout, 1)        conv2 bias
    wsk_ref   : (Cout, Cin)      1x1 skip conv weight (no bias)
    masks_ref : (8, N)           per-tap row+col validity (order == _OFFCENTER)
    out_ref   : (Cout, N)
    """
    f32 = jnp.float32
    x = x_ref[...].astype(f32)
    N = x.shape[1]
    a = _leaky(x)                                   # act(input); leaky(0) == 0

    def conv3x3(w_ref, h):
        # Per-tap accumulation: pltpu.roll lane shifts (XLU slot, no copy) +
        # one VALU multiply with the precomputed validity mask per tap.
        # No padded buffer, no misaligned slice, no (9C, N) concat.
        acc = jnp.dot(w_ref[_CENTER], h, preferred_element_type=f32)
        for j, (t, dh, dw) in enumerate(_OFFCENTER):
            shift = (-(dh * W + dw)) % N            # static python int
            shifted = pltpu.roll(h, shift=shift, axis=1)
            shifted = shifted * masks_ref[j:j + 1, :]
            acc = acc + jnp.dot(w_ref[t], shifted, preferred_element_type=f32)
        return acc

    # conv1 (+ hoisted dense_t1 and conv1 bias via b1_ref), then activation.
    h1 = _leaky(conv3x3(w1_ref, a) + b1_ref[...])

    # conv2 with the 1x1 skip fused in as the accumulator initializer
    # (the skip acts on the raw, non-activated input; no separate add).
    acc2 = jnp.dot(wsk_ref[...], x, preferred_element_type=f32) + b2_ref[...]
    acc2 = acc2 + conv3x3(w2_ref, h1)

    out_ref[...] = (acc2 * INV_SQRT2).astype(out_ref.dtype)


def down_conv_block(x_nchw, t_emb, params):
    """x_nchw: (B, Cin, H, W), t_emb: (B, T)  ->  (B, Cout, H, W)."""
    B, Cin, H, W = x_nchw.shape
    HW = H * W
    N = B * HW
    w1, b1 = params["w1"], params["b1"]          # (Cout, Cin, 3, 3), (Cout,)
    wt, bt = params["wt"], params["bt"]          # (Cout, T), (Cout,)
    w2, b2 = params["w2"], params["b2"]          # (Cout, Cout, 3, 3), (Cout,)
    wsk = params["wsk"]                          # (Cout, Cin, 1, 1)
    Cout = w1.shape[0]

    # ---- layout plumbing (tiny XLA ops at these shapes) ----
    # Batch folded onto lanes: column index n = b*HW + r*W + c.
    x_cm = jnp.transpose(x_nchw.reshape(B, Cin, HW), (1, 0, 2)).reshape(Cin, N)
    # Tap-major weights: w_taps[t] = w[:, :, kh, kw] with t = kh*3 + kw.
    w1_taps = jnp.transpose(w1, (2, 3, 0, 1)).reshape(9, Cout, Cin)
    w2_taps = jnp.transpose(w2, (2, 3, 0, 1)).reshape(9, Cout, Cout)
    wsk_f = wsk[:, :, 0, 0]                                    # (Cout, Cin)
    # dense_t1 hoisted out of the kernel; its bias and conv1's bias are folded
    # into one per-batch bias map, lane-broadcast to match the folded layout.
    tproj = (jnp.dot(t_emb, wt.T, precision=lax.Precision.HIGHEST)
             + bt + b1)                                        # (B, Cout)
    b1_map = jnp.repeat(tproj.T, HW, axis=1)                   # (Cout, N)
    b2_c = b2.reshape(Cout, 1)
    # Per-tap validity masks (row + col combined).  The same pattern tiles each
    # batch block, so a full-lane roll can never leak data across the batch
    # seam into an unmasked position.
    n = jnp.arange(N, dtype=jnp.int32)
    m = n % HW
    r, c = m // W, m % W
    rows = []
    for _, dh, dw in _OFFCENTER:
        rows.append((r + dh >= 0) & (r + dh < H) & (c + dw >= 0) & (c + dw < W))
    masks = jnp.stack(rows).astype(x_nchw.dtype)               # (8, N)

    full2 = lambda i: (0, 0)
    full3 = lambda i: (0, 0, 0)
    out_cm = pl.pallas_call(
        functools.partial(downconv_kernel, W=W),
        out_shape=jax.ShapeDtypeStruct((Cout, N), x_nchw.dtype),
        grid=(1,),                       # single step: whole batch at once
        in_specs=[
            pl.BlockSpec((Cin, N), full2),          # x (channel-major, folded)
            pl.BlockSpec((9, Cout, Cin), full3),    # conv1 taps
            pl.BlockSpec((Cout, N), full2),         # conv1 bias + dense_t1
            pl.BlockSpec((9, Cout, Cout), full3),   # conv2 taps
            pl.BlockSpec((Cout, 1), full2),         # conv2 bias
            pl.BlockSpec((Cout, Cin), full2),       # 1x1 skip weight
            pl.BlockSpec((8, N), full2),            # per-tap validity masks
        ],
        out_specs=pl.BlockSpec((Cout, N), full2),
        compiler_params=pltpu.CompilerParams(
            dimension_semantics=("arbitrary",)),
    )(x_cm, w1_taps, b1_map, w2_taps, b2_c, wsk_f, masks)

    # Un-fold the batch (small XLA transpose; free at these demo sizes).
    return (out_cm.reshape(Cout, B, HW).transpose(1, 0, 2)
            .reshape(B, Cout, H, W))


def ref_forward(x, t_emb, p):
    """Pure-JAX (XLA) reference matching the PyTorch forward, NCHW."""
    dn = ("NCHW", "OIHW", "NCHW")
    prec = lax.Precision.HIGHEST
    a = _leaky(x)
    out = lax.conv_general_dilated(a, p["w1"], (1, 1), ((1, 1), (1, 1)),
                                   dimension_numbers=dn, precision=prec)
    out = out + p["b1"][None, :, None, None]
    out = out + (jnp.dot(t_emb, p["wt"].T, precision=prec)
                 + p["bt"])[:, :, None, None]
    out = _leaky(out)
    out = lax.conv_general_dilated(out, p["w2"], (1, 1), ((1, 1), (1, 1)),
                                   dimension_numbers=dn, precision=prec)
    out = out + p["b2"][None, :, None, None]
    skip = lax.conv_general_dilated(x, p["wsk"], (1, 1), ((0, 0), (0, 0)),
                                    dimension_numbers=dn, precision=prec)
    return (out + skip) / np.sqrt(2.0)


if __name__ == "__main__":
    B, Cin, Cout, H, W, T = 2, 4, 8, 16, 16, 128

    key = jax.random.PRNGKey(0)
    ks = jax.random.split(key, 9)
    x = jax.random.normal(ks[0], (B, Cin, H, W), jnp.float32)
    t_emb = jax.random.normal(ks[1], (B, T), jnp.float32)
    params = {
        "w1": jax.random.normal(ks[2], (Cout, Cin, 3, 3), jnp.float32) * 0.1,
        "b1": jax.random.normal(ks[3], (Cout,), jnp.float32) * 0.1,
        "wt": jax.random.normal(ks[4], (Cout, T), jnp.float32) * 0.05,
        "bt": jax.random.normal(ks[5], (Cout,), jnp.float32) * 0.1,
        "w2": jax.random.normal(ks[6], (Cout, Cout, 3, 3), jnp.float32) * 0.1,
        "b2": jax.random.normal(ks[7], (Cout,), jnp.float32) * 0.1,
        "wsk": jax.random.normal(ks[8], (Cout, Cin, 1, 1), jnp.float32) * 0.1,
    }

    out = jax.block_until_ready(down_conv_block(x, t_emb, params))
    ref = jax.block_until_ready(ref_forward(x, t_emb, params))
    np.testing.assert_allclose(np.asarray(out), np.asarray(ref),
                               rtol=1e-3, atol=1e-3)
    print("KERNEL_OK")
</pallas_src>

<mosaic_0001>
module attributes {stable_mosaic.version = 11 : i64} {
  func.func @downconv_kernel(%arg0: i32, %arg1: memref<4x512xf32, #tpu.memory_space<vmem>>, %arg2: memref<9x8x4xf32, #tpu.memory_space<vmem>>, %arg3: memref<8x512xf32, #tpu.memory_space<vmem>>, %arg4: memref<9x8x8xf32, #tpu.memory_space<vmem>>, %arg5: memref<8x1xf32, #tpu.memory_space<vmem>>, %arg6: memref<8x4xf32, #tpu.memory_space<vmem>>, %arg7: memref<8x512xf32, #tpu.memory_space<vmem>>, %arg8: memref<8x512xf32, #tpu.memory_space<vmem>>) attributes {dimension_semantics = [#tpu.dimension_semantics<arbitrary>], iteration_bounds = array<i64: 1>, scalar_prefetch = 0 : i64, scratch_operands = 0 : i64, tpu.core_type = #tpu.core_type<tc>, window_params = [{pipeline_mode = #tpu.pipeline_mode<synchronous>, transform_indices = @transform_0, window_bounds = array<i64: 4, 512>}, {pipeline_mode = #tpu.pipeline_mode<synchronous>, transform_indices = @transform_1, window_bounds = array<i64: 9, 8, 4>}, {pipeline_mode = #tpu.pipeline_mode<synchronous>, transform_indices = @transform_2, window_bounds = array<i64: 8, 512>}, {pipeline_mode = #tpu.pipeline_mode<synchronous>, transform_indices = @transform_3, window_bounds = array<i64: 9, 8, 8>}, {pipeline_mode = #tpu.pipeline_mode<synchronous>, transform_indices = @transform_4, window_bounds = array<i64: 8, 1>}, {pipeline_mode = #tpu.pipeline_mode<synchronous>, transform_indices = @transform_5, window_bounds = array<i64: 8, 4>}, {pipeline_mode = #tpu.pipeline_mode<synchronous>, transform_indices = @transform_6, window_bounds = array<i64: 8, 512>}, {pipeline_mode = #tpu.pipeline_mode<synchronous>, transform_indices = @transform_7, window_bounds = array<i64: 8, 512>}]} {
    %c0 = arith.constant 0 : index
    %c0_0 = arith.constant 0 : index
    %0 = vector.load %arg1[%c0, %c0_0] : memref<4x512xf32, #tpu.memory_space<vmem>>, vector<4x512xf32>
    %cst = arith.constant 0.000000e+00 : f32
    %1 = vector.broadcast %cst : f32 to vector<4x512xf32>
    %2 = arith.cmpf ogt, %0, %1 : vector<4x512xf32>
    %cst_1 = arith.constant 2.000000e-01 : f32
    %3 = vector.broadcast %cst_1 : f32 to vector<4x512xf32>
    %4 = arith.mulf %3, %0 : vector<4x512xf32>
    %5 = arith.select %2, %0, %4 : vector<4x512xi1>, vector<4x512xf32>
    %c4 = arith.constant 4 : index
    %c0_2 = arith.constant 0 : index
    %c0_3 = arith.constant 0 : index
    %6 = vector.load %arg2[%c4, %c0_2, %c0_3] : memref<9x8x4xf32, #tpu.memory_space<vmem>>, vector<1x8x4xf32>
    %7 = vector.shape_cast %6 : vector<1x8x4xf32> to vector<8x4xf32>
    %cst_4 = arith.constant dense<0.000000e+00> : vector<8x512xf32>
    %8 = tpu.matmul %7, %5, %cst_4 {dimension_numbers = #tpu.dot_dimension_numbers<[1], [0], [0], [1], [0, 0, 1, 1], [], []>} : vector<8x4xf32>, vector<4x512xf32>, vector<8x512xf32> -> vector<8x512xf32>
    %c17_i32 = arith.constant 17 : i32
    %9 = tpu.dynamic_rotate %5 by %c17_i32 dim 1 : vector<4x512xf32>, i32 -> vector<4x512xf32>
    %c0_5 = arith.constant 0 : index
    %c0_6 = arith.constant 0 : index
    %10 = vector.load %arg7[%c0_5, %c0_6] : memref<8x512xf32, #tpu.memory_space<vmem>>, vector<1x512xf32>
    %11 = vector.broadcast %10 : vector<1x512xf32> to vector<4x512xf32>
    %12 = arith.mulf %9, %11 : vector<4x512xf32>
    %c0_7 = arith.constant 0 : index
    %c0_8 = arith.constant 0 : index
    %c0_9 = arith.constant 0 : index
    %13 = vector.load %arg2[%c0_7, %c0_8, %c0_9] : memref<9x8x4xf32, #tpu.memory_space<vmem>>, vector<1x8x4xf32>
    %14 = vector.shape_cast %13 : vector<1x8x4xf32> to vector<8x4xf32>
    %cst_10 = arith.constant dense<0.000000e+00> : vector<8x512xf32>
    %15 = tpu.matmul %14, %12, %cst_10 {dimension_numbers = #tpu.dot_dimension_numbers<[1], [0], [0], [1], [0, 0, 1, 1], [], []>} : vector<8x4xf32>, vector<4x512xf32>, vector<8x512xf32> -> vector<8x512xf32>
    %16 = arith.addf %8, %15 : vector<8x512xf32>
    %c16_i32 = arith.constant 16 : i32
    %17 = tpu.dynamic_rotate %5 by %c16_i32 dim 1 : vector<4x512xf32>, i32 -> vector<4x512xf32>
    %c1 = arith.constant 1 : index
    %c0_11 = arith.constant 0 : index
    %18 = vector.load %arg7[%c1, %c0_11] : memref<8x512xf32, #tpu.memory_space<vmem>>, vector<1x512xf32>
    %19 = vector.broadcast %18 : vector<1x512xf32> to vector<4x512xf32>
    %20 = arith.mulf %17, %19 : vector<4x512xf32>
    %c1_12 = arith.constant 1 : index
    %c0_13 = arith.constant 0 : index
    %c0_14 = arith.constant 0 : index
    %21 = vector.load %arg2[%c1_12, %c0_13, %c0_14] : memref<9x8x4xf32, #tpu.memory_space<vmem>>, vector<1x8x4xf32>
    %22 = vector.shape_cast %21 : vector<1x8x4xf32> to vector<8x4xf32>
    %cst_15 = arith.constant dense<0.000000e+00> : vector<8x512xf32>
    %23 = tpu.matmul %22, %20, %cst_15 {dimension_numbers = #tpu.dot_dimension_numbers<[1], [0], [0], [1], [0, 0, 1, 1], [], []>} : vector<8x4xf32>, vector<4x512xf32>, vector<8x512xf32> -> vector<8x512xf32>
    %24 = arith.addf %16, %23 : vector<8x512xf32>
    %c15_i32 = arith.constant 15 : i32
    %25 = tpu.dynamic_rotate %5 by %c15_i32 dim 1 : vector<4x512xf32>, i32 -> vector<4x512xf32>
    %c2 = arith.constant 2 : index
    %c0_16 = arith.constant 0 : index
    %26 = vector.load %arg7[%c2, %c0_16] : memref<8x512xf32, #tpu.memory_space<vmem>>, vector<1x512xf32>
    %27 = vector.broadcast %26 : vector<1x512xf32> to vector<4x512xf32>
    %28 = arith.mulf %25, %27 : vector<4x512xf32>
    %c2_17 = arith.constant 2 : index
    %c0_18 = arith.constant 0 : index
    %c0_19 = arith.constant 0 : index
    %29 = vector.load %arg2[%c2_17, %c0_18, %c0_19] : memref<9x8x4xf32, #tpu.memory_space<vmem>>, vector<1x8x4xf32>
    %30 = vector.shape_cast %29 : vector<1x8x4xf32> to vector<8x4xf32>
    %cst_20 = arith.constant dense<0.000000e+00> : vector<8x512xf32>
    %31 = tpu.matmul %30, %28, %cst_20 {dimension_numbers = #tpu.dot_dimension_numbers<[1], [0], [0], [1], [0, 0, 1, 1], [], []>} : vector<8x4xf32>, vector<4x512xf32>, vector<8x512xf32> -> vector<8x512xf32>
    %32 = arith.addf %24, %31 : vector<8x512xf32>
    %c1_i32 = arith.constant 1 : i32
    %33 = tpu.dynamic_rotate %5 by %c1_i32 dim 1 : vector<4x512xf32>, i32 -> vector<4x512xf32>
    %c3 = arith.constant 3 : index
    %c0_21 = arith.constant 0 : index
    %34 = vector.load %arg7[%c3, %c0_21] : memref<8x512xf32, #tpu.memory_space<vmem>>, vector<1x512xf32>
    %35 = vector.broadcast %34 : vector<1x512xf32> to vector<4x512xf32>
    %36 = arith.mulf %33, %35 : vector<4x512xf32>
    %c3_22 = arith.constant 3 : index
    %c0_23 = arith.constant 0 : index
    %c0_24 = arith.constant 0 : index
    %37 = vector.load %arg2[%c3_22, %c0_23, %c0_24] : memref<9x8x4xf32, #tpu.memory_space<vmem>>, vector<1x8x4xf32>
    %38 = vector.shape_cast %37 : vector<1x8x4xf32> to vector<8x4xf32>
    %cst_25 = arith.constant dense<0.000000e+00> : vector<8x512xf32>
    %39 = tpu.matmul %38, %36, %cst_25 {dimension_numbers = #tpu.dot_dimension_numbers<[1], [0], [0], [1], [0, 0, 1, 1], [], []>} : vector<8x4xf32>, vector<4x512xf32>, vector<8x512xf32> -> vector<8x512xf32>
    %40 = arith.addf %32, %39 : vector<8x512xf32>
    %c511_i32 = arith.constant 511 : i32
    %41 = tpu.dynamic_rotate %5 by %c511_i32 dim 1 : vector<4x512xf32>, i32 -> vector<4x512xf32>
    %c4_26 = arith.constant 4 : index
    %c0_27 = arith.constant 0 : index
    %42 = vector.load %arg7[%c4_26, %c0_27] : memref<8x512xf32, #tpu.memory_space<vmem>>, vector<1x512xf32>
    %43 = vector.broadcast %42 : vector<1x512xf32> to vector<4x512xf32>
    %44 = arith.mulf %41, %43 : vector<4x512xf32>
    %c5 = arith.constant 5 : index
    %c0_28 = arith.constant 0 : index
    %c0_29 = arith.constant 0 : index
    %45 = vector.load %arg2[%c5, %c0_28, %c0_29] : memref<9x8x4xf32, #tpu.memory_space<vmem>>, vector<1x8x4xf32>
    %46 = vector.shape_cast %45 : vector<1x8x4xf32> to vector<8x4xf32>
    %cst_30 = arith.constant dense<0.000000e+00> : vector<8x512xf32>
    %47 = tpu.matmul %46, %44, %cst_30 {dimension_numbers = #tpu.dot_dimension_numbers<[1], [0], [0], [1], [0, 0, 1, 1], [], []>} : vector<8x4xf32>, vector<4x512xf32>, vector<8x512xf32> -> vector<8x512xf32>
    %48 = arith.addf %40, %47 : vector<8x512xf32>
    %c497_i32 = arith.constant 497 : i32
    %49 = tpu.dynamic_rotate %5 by %c497_i32 dim 1 : vector<4x512xf32>, i32 -> vector<4x512xf32>
    %c5_31 = arith.constant 5 : index
    %c0_32 = arith.constant 0 : index
    %50 = vector.load %arg7[%c5_31, %c0_32] : memref<8x512xf32, #tpu.memory_space<vmem>>, vector<1x512xf32>
    %51 = vector.broadcast %50 : vector<1x512xf32> to vector<4x512xf32>
    %52 = arith.mulf %49, %51 : vector<4x512xf32>
    %c6 = arith.constant 6 : index
    %c0_33 = arith.constant 0 : index
    %c0_34 = arith.constant 0 : index
    %53 = vector.load %arg2[%c6, %c0_33, %c0_34] : memref<9x8x4xf32, #tpu.memory_space<vmem>>, vector<1x8x4xf32>
    %54 = vector.shape_cast %53 : vector<1x8x4xf32> to vector<8x4xf32>
    %cst_35 = arith.constant dense<0.000000e+00> : vector<8x512xf32>
    %55 = tpu.matmul %54, %52, %cst_35 {dimension_numbers = #tpu.dot_dimension_numbers<[1], [0], [0], [1], [0, 0, 1, 1], [], []>} : vector<8x4xf32>, vector<4x512xf32>, vector<8x512xf32> -> vector<8x512xf32>
    %56 = arith.addf %48, %55 : vector<8x512xf32>
    %c496_i32 = arith.constant 496 : i32
    %57 = tpu.dynamic_rotate %5 by %c496_i32 dim 1 : vector<4x512xf32>, i32 -> vector<4x512xf32>
    %c6_36 = arith.constant 6 : index
    %c0_37 = arith.constant 0 : index
    %58 = vector.load %arg7[%c6_36, %c0_37] : memref<8x512xf32, #tpu.memory_space<vmem>>, vector<1x512xf32>
    %59 = vector.broadcast %58 : vector<1x512xf32> to vector<4x512xf32>
    %60 = arith.mulf %57, %59 : vector<4x512xf32>
    %c7 = arith.constant 7 : index
    %c0_38 = arith.constant 0 : index
    %c0_39 = arith.constant 0 : index
    %61 = vector.load %arg2[%c7, %c0_38, %c0_39] : memref<9x8x4xf32, #tpu.memory_space<vmem>>, vector<1x8x4xf32>
    %62 = vector.shape_cast %61 : vector<1x8x4xf32> to vector<8x4xf32>
    %cst_40 = arith.constant dense<0.000000e+00> : vector<8x512xf32>
    %63 = tpu.matmul %62, %60, %cst_40 {dimension_numbers = #tpu.dot_dimension_numbers<[1], [0], [0], [1], [0, 0, 1, 1], [], []>} : vector<8x4xf32>, vector<4x512xf32>, vector<8x512xf32> -> vector<8x512xf32>
    %64 = arith.addf %56, %63 : vector<8x512xf32>
    %c495_i32 = arith.constant 495 : i32
    %65 = tpu.dynamic_rotate %5 by %c495_i32 dim 1 : vector<4x512xf32>, i32 -> vector<4x512xf32>
    %c7_41 = arith.constant 7 : index
    %c0_42 = arith.constant 0 : index
    %66 = vector.load %arg7[%c7_41, %c0_42] : memref<8x512xf32, #tpu.memory_space<vmem>>, vector<1x512xf32>
    %67 = vector.broadcast %66 : vector<1x512xf32> to vector<4x512xf32>
    %68 = arith.mulf %65, %67 : vector<4x512xf32>
    %c8 = arith.constant 8 : index
    %c0_43 = arith.constant 0 : index
    %c0_44 = arith.constant 0 : index
    %69 = vector.load %arg2[%c8, %c0_43, %c0_44] : memref<9x8x4xf32, #tpu.memory_space<vmem>>, vector<1x8x4xf32>
    %70 = vector.shape_cast %69 : vector<1x8x4xf32> to vector<8x4xf32>
    %cst_45 = arith.constant dense<0.000000e+00> : vector<8x512xf32>
    %71 = tpu.matmul %70, %68, %cst_45 {dimension_numbers = #tpu.dot_dimension_numbers<[1], [0], [0], [1], [0, 0, 1, 1], [], []>} : vector<8x4xf32>, vector<4x512xf32>, vector<8x512xf32> -> vector<8x512xf32>
    %72 = arith.addf %64, %71 : vector<8x512xf32>
    %c0_46 = arith.constant 0 : index
    %c0_47 = arith.constant 0 : index
    %73 = vector.load %arg3[%c0_46, %c0_47] : memref<8x512xf32, #tpu.memory_space<vmem>>, vector<8x512xf32>
    %74 = arith.addf %72, %73 : vector<8x512xf32>
    %cst_48 = arith.constant 0.000000e+00 : f32
    %75 = vector.broadcast %cst_48 : f32 to vector<8x512xf32>
    %76 = arith.cmpf ogt, %74, %75 : vector<8x512xf32>
    %cst_49 = arith.constant 2.000000e-01 : f32
    %77 = vector.broadcast %cst_49 : f32 to vector<8x512xf32>
    %78 = arith.mulf %77, %74 : vector<8x512xf32>
    %79 = arith.select %76, %74, %78 : vector<8x512xi1>, vector<8x512xf32>
    %c0_50 = arith.constant 0 : index
    %c0_51 = arith.constant 0 : index
    %80 = vector.load %arg6[%c0_50, %c0_51] : memref<8x4xf32, #tpu.memory_space<vmem>>, vector<8x4xf32>
    %cst_52 = arith.constant dense<0.000000e+00> : vector<8x512xf32>
    %81 = tpu.matmul %80, %0, %cst_52 {dimension_numbers = #tpu.dot_dimension_numbers<[1], [0], [0], [1], [0, 0, 1, 1], [], []>} : vector<8x4xf32>, vector<4x512xf32>, vector<8x512xf32> -> vector<8x512xf32>
    %c0_53 = arith.constant 0 : index
    %c0_54 = arith.constant 0 : index
    %82 = vector.load %arg5[%c0_53, %c0_54] : memref<8x1xf32, #tpu.memory_space<vmem>>, vector<8x1xf32>
    %83 = vector.broadcast %82 : vector<8x1xf32> to vector<8x512xf32>
    %84 = arith.addf %81, %83 : vector<8x512xf32>
    %c4_55 = arith.constant 4 : index
    %c0_56 = arith.constant 0 : index
    %c0_57 = arith.constant 0 : index
    %85 = vector.load %arg4[%c4_55, %c0_56, %c0_57] : memref<9x8x8xf32, #tpu.memory_space<vmem>>, vector<1x8x8xf32>
    %86 = vector.shape_cast %85 : vector<1x8x8xf32> to vector<8x8xf32>
    %cst_58 = arith.constant dense<0.000000e+00> : vector<8x512xf32>
    %87 = tpu.matmul %86, %79, %cst_58 {dimension_numbers = #tpu.dot_dimension_numbers<[1], [0], [0], [1], [0, 0, 1, 1], [], []>} : vector<8x8xf32>, vector<8x512xf32>, vector<8x512xf32> -> vector<8x512xf32>
    %c17_i32_59 = arith.constant 17 : i32
    %88 = tpu.dynamic_rotate %79 by %c17_i32_59 dim 1 : vector<8x512xf32>, i32 -> vector<8x512xf32>
    %c0_60 = arith.constant 0 : index
    %c0_61 = arith.constant 0 : index
    %89 = vector.load %arg7[%c0_60, %c0_61] : memref<8x512xf32, #tpu.memory_space<vmem>>, vector<1x512xf32>
    %90 = vector.broadcast %89 : vector<1x512xf32> to vector<8x512xf32>
    %91 = arith.mulf %88, %90 : vector<8x512xf32>
    %c0_62 = arith.constant 0 : index
    %c0_63 = arith.constant 0 : index
    %c0_64 = arith.constant 0 : index
    %92 = vector.load %arg4[%c0_62, %c0_63, %c0_64] : memref<9x8x8xf32, #tpu.memory_space<vmem>>, vector<1x8x8xf32>
    %93 = vector.shape_cast %92 : vector<1x8x8xf32> to vector<8x8xf32>
    %cst_65 = arith.constant dense<0.000000e+00> : vector<8x512xf32>
    %94 = tpu.matmul %93, %91, %cst_65 {dimension_numbers = #tpu.dot_dimension_numbers<[1], [0], [0], [1], [0, 0, 1, 1], [], []>} : vector<8x8xf32>, vector<8x512xf32>, vector<8x512xf32> -> vector<8x512xf32>
    %95 = arith.addf %87, %94 : vector<8x512xf32>
    %c16_i32_66 = arith.constant 16 : i32
    %96 = tpu.dynamic_rotate %79 by %c16_i32_66 dim 1 : vector<8x512xf32>, i32 -> vector<8x512xf32>
    %c1_67 = arith.constant 1 : index
    %c0_68 = arith.constant 0 : index
    %97 = vector.load %arg7[%c1_67, %c0_68] : memref<8x512xf32, #tpu.memory_space<vmem>>, vector<1x512xf32>
    %98 = vector.broadcast %97 : vector<1x512xf32> to vector<8x512xf32>
    %99 = arith.mulf %96, %98 : vector<8x512xf32>
    %c1_69 = arith.constant 1 : index
    %c0_70 = arith.constant 0 : index
    %c0_71 = arith.constant 0 : index
    %100 = vector.load %arg4[%c1_69, %c0_70, %c0_71] : memref<9x8x8xf32, #tpu.memory_space<vmem>>, vector<1x8x8xf32>
    %101 = vector.shape_cast %100 : vector<1x8x8xf32> to vector<8x8xf32>
    %cst_72 = arith.constant dense<0.000000e+00> : vector<8x512xf32>
    %102 = tpu.matmul %101, %99, %cst_72 {dimension_numbers = #tpu.dot_dimension_numbers<[1], [0], [0], [1], [0, 0, 1, 1], [], []>} : vector<8x8xf32>, vector<8x512xf32>, vector<8x512xf32> -> vector<8x512xf32>
    %103 = arith.addf %95, %102 : vector<8x512xf32>
    %c15_i32_73 = arith.constant 15 : i32
    %104 = tpu.dynamic_rotate %79 by %c15_i32_73 dim 1 : vector<8x512xf32>, i32 -> vector<8x512xf32>
    %c2_74 = arith.constant 2 : index
    %c0_75 = arith.constant 0 : index
    %105 = vector.load %arg7[%c2_74, %c0_75] : memref<8x512xf32, #tpu.memory_space<vmem>>, vector<1x512xf32>
    %106 = vector.broadcast %105 : vector<1x512xf32> to vector<8x512xf32>
    %107 = arith.mulf %104, %106 : vector<8x512xf32>
    %c2_76 = arith.constant 2 : index
    %c0_77 = arith.constant 0 : index
    %c0_78 = arith.constant 0 : index
    %108 = vector.load %arg4[%c2_76, %c0_77, %c0_78] : memref<9x8x8xf32, #tpu.memory_space<vmem>>, vector<1x8x8xf32>
    %109 = vector.shape_cast %108 : vector<1x8x8xf32> to vector<8x8xf32>
    %cst_79 = arith.constant dense<0.000000e+00> : vector<8x512xf32>
    %110 = tpu.matmul %109, %107, %cst_79 {dimension_numbers = #tpu.dot_dimension_numbers<[1], [0], [0], [1], [0, 0, 1, 1], [], []>} : vector<8x8xf32>, vector<8x512xf32>, vector<8x512xf32> -> vector<8x512xf32>
    %111 = arith.addf %103, %110 : vector<8x512xf32>
    %c1_i32_80 = arith.constant 1 : i32
    %112 = tpu.dynamic_rotate %79 by %c1_i32_80 dim 1 : vector<8x512xf32>, i32 -> vector<8x512xf32>
    %c3_81 = arith.constant 3 : index
    %c0_82 = arith.constant 0 : index
    %113 = vector.load %arg7[%c3_81, %c0_82] : memref<8x512xf32, #tpu.memory_space<vmem>>, vector<1x512xf32>
    %114 = vector.broadcast %113 : vector<1x512xf32> to vector<8x512xf32>
    %115 = arith.mulf %112, %114 : vector<8x512xf32>
    %c3_83 = arith.constant 3 : index
    %c0_84 = arith.constant 0 : index
    %c0_85 = arith.constant 0 : index
    %116 = vector.load %arg4[%c3_83, %c0_84, %c0_85] : memref<9x8x8xf32, #tpu.memory_space<vmem>>, vector<1x8x8xf32>
    %117 = vector.shape_cast %116 : vector<1x8x8xf32> to vector<8x8xf32>
    %cst_86 = arith.constant dense<0.000000e+00> : vector<8x512xf32>
    %118 = tpu.matmul %117, %115, %cst_86 {dimension_numbers = #tpu.dot_dimension_numbers<[1], [0], [0], [1], [0, 0, 1, 1], [], []>} : vector<8x8xf32>, vector<8x512xf32>, vector<8x512xf32> -> vector<8x512xf32>
    %119 = arith.addf %111, %118 : vector<8x512xf32>
    %c511_i32_87 = arith.constant 511 : i32
    %120 = tpu.dynamic_rotate %79 by %c511_i32_87 dim 1 : vector<8x512xf32>, i32 -> vector<8x512xf32>
    %c4_88 = arith.constant 4 : index
    %c0_89 = arith.constant 0 : index
    %121 = vector.load %arg7[%c4_88, %c0_89] : memref<8x512xf32, #tpu.memory_space<vmem>>, vector<1x512xf32>
    %122 = vector.broadcast %121 : vector<1x512xf32> to vector<8x512xf32>
    %123 = arith.mulf %120, %122 : vector<8x512xf32>
    %c5_90 = arith.constant 5 : index
    %c0_91 = arith.constant 0 : index
    %c0_92 = arith.constant 0 : index
    %124 = vector.load %arg4[%c5_90, %c0_91, %c0_92] : memref<9x8x8xf32, #tpu.memory_space<vmem>>, vector<1x8x8xf32>
    %125 = vector.shape_cast %124 : vector<1x8x8xf32> to vector<8x8xf32>
    %cst_93 = arith.constant dense<0.000000e+00> : vector<8x512xf32>
    %126 = tpu.matmul %125, %123, %cst_93 {dimension_numbers = #tpu.dot_dimension_numbers<[1], [0], [0], [1], [0, 0, 1, 1], [], []>} : vector<8x8xf32>, vector<8x512xf32>, vector<8x512xf32> -> vector<8x512xf32>
    %127 = arith.addf %119, %126 : vector<8x512xf32>
    %c497_i32_94 = arith.constant 497 : i32
    %128 = tpu.dynamic_rotate %79 by %c497_i32_94 dim 1 : vector<8x512xf32>, i32 -> vector<8x512xf32>
    %c5_95 = arith.constant 5 : index
    %c0_96 = arith.constant 0 : index
    %129 = vector.load %arg7[%c5_95, %c0_96] : memref<8x512xf32, #tpu.memory_space<vmem>>, vector<1x512xf32>
    %130 = vector.broadcast %129 : vector<1x512xf32> to vector<8x512xf32>
    %131 = arith.mulf %128, %130 : vector<8x512xf32>
    %c6_97 = arith.constant 6 : index
    %c0_98 = arith.constant 0 : index
    %c0_99 = arith.constant 0 : index
    %132 = vector.load %arg4[%c6_97, %c0_98, %c0_99] : memref<9x8x8xf32, #tpu.memory_space<vmem>>, vector<1x8x8xf32>
    %133 = vector.shape_cast %132 : vector<1x8x8xf32> to vector<8x8xf32>
    %cst_100 = arith.constant dense<0.000000e+00> : vector<8x512xf32>
    %134 = tpu.matmul %133, %131, %cst_100 {dimension_numbers = #tpu.dot_dimension_numbers<[1], [0], [0], [1], [0, 0, 1, 1], [], []>} : vector<8x8xf32>, vector<8x512xf32>, vector<8x512xf32> -> vector<8x512xf32>
    %135 = arith.addf %127, %134 : vector<8x512xf32>
    %c496_i32_101 = arith.constant 496 : i32
    %136 = tpu.dynamic_rotate %79 by %c496_i32_101 dim 1 : vector<8x512xf32>, i32 -> vector<8x512xf32>
    %c6_102 = arith.constant 6 : index
    %c0_103 = arith.constant 0 : index
    %137 = vector.load %arg7[%c6_102, %c0_103] : memref<8x512xf32, #tpu.memory_space<vmem>>, vector<1x512xf32>
    %138 = vector.broadcast %137 : vector<1x512xf32> to vector<8x512xf32>
    %139 = arith.mulf %136, %138 : vector<8x512xf32>
    %c7_104 = arith.constant 7 : index
    %c0_105 = arith.constant 0 : index
    %c0_106 = arith.constant 0 : index
    %140 = vector.load %arg4[%c7_104, %c0_105, %c0_106] : memref<9x8x8xf32, #tpu.memory_space<vmem>>, vector<1x8x8xf32>
    %141 = vector.shape_cast %140 : vector<1x8x8xf32> to vector<8x8xf32>
    %cst_107 = arith.constant dense<0.000000e+00> : vector<8x512xf32>
    %142 = tpu.matmul %141, %139, %cst_107 {dimension_numbers = #tpu.dot_dimension_numbers<[1], [0], [0], [1], [0, 0, 1, 1], [], []>} : vector<8x8xf32>, vector<8x512xf32>, vector<8x512xf32> -> vector<8x512xf32>
    %143 = arith.addf %135, %142 : vector<8x512xf32>
    %c495_i32_108 = arith.constant 495 : i32
    %144 = tpu.dynamic_rotate %79 by %c495_i32_108 dim 1 : vector<8x512xf32>, i32 -> vector<8x512xf32>
    %c7_109 = arith.constant 7 : index
    %c0_110 = arith.constant 0 : index
    %145 = vector.load %arg7[%c7_109, %c0_110] : memref<8x512xf32, #tpu.memory_space<vmem>>, vector<1x512xf32>
    %146 = vector.broadcast %145 : vector<1x512xf32> to vector<8x512xf32>
    %147 = arith.mulf %144, %146 : vector<8x512xf32>
    %c8_111 = arith.constant 8 : index
    %c0_112 = arith.constant 0 : index
    %c0_113 = arith.constant 0 : index
    %148 = vector.load %arg4[%c8_111, %c0_112, %c0_113] : memref<9x8x8xf32, #tpu.memory_space<vmem>>, vector<1x8x8xf32>
    %149 = vector.shape_cast %148 : vector<1x8x8xf32> to vector<8x8xf32>
    %cst_114 = arith.constant dense<0.000000e+00> : vector<8x512xf32>
    %150 = tpu.matmul %149, %147, %cst_114 {dimension_numbers = #tpu.dot_dimension_numbers<[1], [0], [0], [1], [0, 0, 1, 1], [], []>} : vector<8x8xf32>, vector<8x512xf32>, vector<8x512xf32> -> vector<8x512xf32>
    %151 = arith.addf %143, %150 : vector<8x512xf32>
    %152 = arith.addf %84, %151 : vector<8x512xf32>
    %cst_115 = arith.constant 0.707106769 : f32
    %153 = vector.broadcast %cst_115 : f32 to vector<8x512xf32>
    %154 = arith.mulf %152, %153 : vector<8x512xf32>
    %c0_116 = arith.constant 0 : index
    %c0_117 = arith.constant 0 : index
    %155 = vector.load %arg8[%c0_116, %c0_117] : memref<8x512xf32, #tpu.memory_space<vmem>>, vector<8x512xf32>
    tpu.vector_store %arg8[%c0_116, %c0_117], %154 {strides = array<i32>} : memref<8x512xf32, #tpu.memory_space<vmem>>, vector<8x512xf32>,
    return
  }
  func.func @transform_0(%arg0: i32) -> (i32, i32) {
    %c0_i32 = arith.constant 0 : i32
    %c0_i32_0 = arith.constant 0 : i32
    %c0_i32_1 = arith.constant 0 : i32
    return %c0_i32, %c0_i32_0 : i32, i32
  }
  func.func @transform_1(%arg0: i32) -> (i32, i32, i32) {
    %c0_i32 = arith.constant 0 : i32
    %c0_i32_0 = arith.constant 0 : i32
    %c0_i32_1 = arith.constant 0 : i32
    %c0_i32_2 = arith.constant 0 : i32
    return %c0_i32, %c0_i32_0, %c0_i32_1 : i32, i32, i32
  }
  func.func @transform_2(%arg0: i32) -> (i32, i32) {
    %c0_i32 = arith.constant 0 : i32
    %c0_i32_0 = arith.constant 0 : i32
    %c0_i32_1 = arith.constant 0 : i32
    return %c0_i32, %c0_i32_0 : i32, i32
  }
  func.func @transform_3(%arg0: i32) -> (i32, i32, i32) {
    %c0_i32 = arith.constant 0 : i32
    %c0_i32_0 = arith.constant 0 : i32
    %c0_i32_1 = arith.constant 0 : i32
    %c0_i32_2 = arith.constant 0 : i32
    return %c0_i32, %c0_i32_0, %c0_i32_1 : i32, i32, i32
  }
  func.func @transform_4(%arg0: i32) -> (i32, i32) {
    %c0_i32 = arith.constant 0 : i32
    %c0_i32_0 = arith.constant 0 : i32
    %c0_i32_1 = arith.constant 0 : i32
    return %c0_i32, %c0_i32_0 : i32, i32
  }
  func.func @transform_5(%arg0: i32) -> (i32, i32) {
    %c0_i32 = arith.constant 0 : i32
    %c0_i32_0 = arith.constant 0 : i32
    %c0_i32_1 = arith.constant 0 : i32
    return %c0_i32, %c0_i32_0 : i32, i32
  }
  func.func @transform_6(%arg0: i32) -> (i32, i32) {
    %c0_i32 = arith.constant 0 : i32
    %c0_i32_0 = arith.constant 0 : i32
    %c0_i32_1 = arith.constant 0 : i32
    return %c0_i32, %c0_i32_0 : i32, i32
  }
  func.func @transform_7(%arg0: i32) -> (i32, i32) {
    %c0_i32 = arith.constant 0 : i32
    %c0_i32_0 = arith.constant 0 : i32
    %c0_i32_1 = arith.constant 0 : i32
    return %c0_i32, %c0_i32_0 : i32, i32
  }
}

</mosaic_0001>

<bundles_post_ra>
// kernel: tpu_custom_call.1
= control target key start
LH: loop header
LB: loop body
LE: loop exit
PB: predicated region body
PF: predicated region fallthrough
CT: control target
= control target key end

     0   :  { %v3718_v4 = vmov 0.0   ;;  %s4466_s0 = inlined_call_operand.vmem [shape: f32[4,512], index: 0, kind: input, shape index: {}]   ;;  %s4467_s1 = inlined_call_operand.vmem [shape: f32[9,8,4], index: 1, kind: input, shape index: {}]   ;;  %s4468_s2 = inlined_call_operand.vmem [shape: f32[8,512], index: 2, kind: input, shape index: {}]   ;;  %s4469_s3 = inlined_call_operand.vmem [shape: f32[9,8,8], index: 3, kind: input, shape index: {}]   ;;  %s4470_s4 = inlined_call_operand.vmem [shape: f32[8,1], index: 4, kind: input, shape index: {}]   ;;  %s4471_s5 = inlined_call_operand.vmem [shape: f32[8,4], index: 5, kind: input, shape index: {}]   ;;  %s4472_s6 = inlined_call_operand.vmem [shape: f32[8,512], index: 6, kind: input, shape index: {}]   ;;  %s4473_s7 = inlined_call_operand.hbm [shape: f32[8,512], index: 7, kind: output, shape index: {}]  }
   0x1   :  { %v3772_v0 = vld [vmem:[%s4466_s0 + $0x8] sm:$0xff]  ;;  %v3777_v1 = vld [vmem:[%s4466_s0] sm:$0xff]  ;;  %166 = vmatprep.mubr.f32.mxu0 %v3718_v4  ;;  %237 = vmatprep.mubr.f32.mxu1 %v3718_v4  ;;  %s3719_s0 = smov 17  }
   0x2   :  { %vm30_vm0 = vcmp.gt.f32.partialorder %v3772_v0, 0.0  ;;  %v32_v2 = vmul.f32 0.2, %v3772_v0  ;;  %vm29_vm1 = vcmp.gt.f32.partialorder %v3777_v1, 0.0  ;;  %v31_v3 = vmul.f32 0.2, %v3777_v1 }
   0x4   :  { %v3786_v5 = vsel %vm30_vm0, %v3772_v0, %v32_v2  ;;  %v3789_v6 = vsel %vm29_vm1, %v3777_v1, %v31_v3 }
   0x5   :  { %47 = vrot.lane.b32.xlu1 %v3786_v5, %s3719_s0  ;;  %43 = vrot.lane.b32.xlu0 %v3789_v6, %s3719_s0  ;;  %v3797_v7 = vcombine.high %v3786_v5, %v3786_v5  ;;  %v3801_v8 = vcombine.high %v3789_v6, %v3789_v6 }
   0x6   :  { %12 = vsyncpa [#allocation3], 0  ;;  %s3720_s28 = smov 16   ;;  %s3721_s29 = smov 15   ;;  %v51_v9 = vlaneseq  ;;  %vm89_vm3 = vcmask 1043456   ;;  %v84_v35 = vld [vmem:[%s4467_s1] sm:$0xff] }
   0x7   :  { %s3722_s30 = smov 1   ;;  %s3723_s8 = smov 127   ;;  %v58_v16 = vld [vmem:[%s4472_s6] ss:$8 sm:$0xf]  ;;  %vm85_vm5 = vcmask 31744  }
   0x8   :  { %s3724_s9 = smov 113   ;;  %s3725_s10 = smov 112   ;;  %v61_v10 = vshrl.u32 %v51_v9, 7  ;;  %v3863_v11 = vand.u32 127, %v51_v9  ;;  %v3507_v53 = vld [vmem:[%s4467_s1 + $0x20] sm:$0xff]  ;;  %vm2021_vm0 = vcmask 64512  }
   0x9   :  { %49 = vrot.lane.b32.xlu1 %v3797_v7, %s3719_s0  ;;  %45 = vrot.lane.b32.xlu0 %v3801_v8, %s3719_s0  ;;  %s3726_s11 = smov 111   ;;  %v3520_v19 = vld [vmem:[%s4472_s6 + $0x1] ss:$8 sm:$0xf]  ;;  %s3728_s13 = smov [#allocation2]  }
   0xa   :  { %v3865_v12 = vsub.s32 0, %v61_v10  ;;  %v3867_v13 = vsub.s32 2, %v61_v10  ;;  %v3869_v14 = vsub.s32 1, %v61_v10  ;;  %v3871_v15 = vsub.s32 3, %v61_v10  ;;  %v3521_v10 = vld [vmem:[%s4467_s1 + $0x8] sm:$0xff]  ;;  %s3499_s14 = sshll.u32 %s3728_s13, 4  ;;  %s3500_s14 = int_to_ptr.vmem [resolvable:$true] %s3499_s14 }
   0xb   :  { %vm53_vm2 = vcmp.lt.s32.totalorder %v3863_v11, 17  ;;  %vm405_vm4 = vcmp.lt.s32.totalorder %v3863_v11, 16  ;;  %v3528_v43 = vld [vmem:[%s4472_s6 + $0x2] ss:$8 sm:$0xf]  ;;  %vm608_vm6 = vcmp.lt.s32.totalorder %v3863_v11, 15  ;;  %p3699_p1 = scmp.lt.s32.totalorder %s3500_s14, %s3500_s14 }
   0xc   :  { %v3881_v20 = vrot.slane %v58_v16, %v3865_v12  ;;  %v3884_v21 = vrot.slane %v58_v16, %v3867_v13  ;;  %v3887_v22 = vrot.slane %v58_v16, %v3869_v14  ;;  %v3890_v23 = vrot.slane %v58_v16, %v3871_v15  ;;  %v3536_v61 = vld [vmem:[%s4472_s6 + $0x3] ss:$8 sm:$0xf] }
   0xd   :  { %397 = vrot.lane.b32.xlu0 %v3789_v6, %s3720_s28  ;;  %399 = vrot.lane.b32.xlu1 %v3801_v8, %s3720_s28  ;;  %v3894_v26 = vrot.slane %v3520_v19, %v3869_v14  ;;  %v3921_v40 = vrot.slane %v3520_v19, %v3871_v15  ;;  %v3924_v41 = vrot.slane %v3520_v19, %v3867_v13  ;;  %vm811_vm7 = vcmp.lt.s32.totalorder %v3863_v11, 1 }
   0xe   :  { %v3927_v42 = vrot.slane %v3520_v19, %v3865_v12  ;;  %v3952_v50 = vrot.slane %v3528_v43, %v3869_v14  ;;  %v3966_v58 = vrot.slane %v3528_v43, %v3871_v15  ;;  %v3971_v59 = vrot.slane %v3528_v43, %v3867_v13 }
   0xf   :  { %v3974_v60 = vrot.slane %v3528_v43, %v3865_v12  ;;  %vm1014_vm8 = vcmp.lt.s32.totalorder %v3863_v11, 127  ;;  %vm1217_vm9 = vcmp.lt.s32.totalorder %v3863_v11, 113  ;;  %vm1420_vm10 = vcmp.lt.s32.totalorder %v3863_v11, 112 }
  0x10   :  { %vm1623_vm11 = vcmp.lt.s32.totalorder %v3863_v11, 111  ;;  %v3605_v11 = vld [vmem:[%s4469_s3 + $0x40] sm:$0xff] }
  0x11   :  { %401 = vrot.lane.b32.xlu0 %v3786_v5, %s3720_s28  ;;  %403 = vrot.lane.b32.xlu1 %v3797_v7, %s3720_s28 }
  0x15   :  { %600 = vrot.lane.b32.xlu0 %v3789_v6, %s3721_s29  ;;  %602 = vrot.lane.b32.xlu1 %v3801_v8, %s3721_s29 }
  0x19   :  { %604 = vrot.lane.b32.xlu0 %v3786_v5, %s3721_s29  ;;  %606 = vrot.lane.b32.xlu1 %v3797_v7, %s3721_s29 }
  0x1d   :  { %803 = vrot.lane.b32.xlu0 %v3789_v6, %s3722_s30  ;;  %805 = vrot.lane.b32.xlu1 %v3801_v8, %s3722_s30 }
  0x21   :  { %807 = vrot.lane.b32.xlu0 %v3786_v5, %s3722_s30  ;;  %809 = vrot.lane.b32.xlu1 %v3797_v7, %s3722_s30 }
  0x25   :  { %1006 = vrot.lane.b32.xlu0 %v3789_v6, %s3723_s8  ;;  %1008 = vrot.lane.b32.xlu1 %v3801_v8, %s3723_s8 }
  0x29   :  { %1010 = vrot.lane.b32.xlu0 %v3786_v5, %s3723_s8  ;;  %1012 = vrot.lane.b32.xlu1 %v3797_v7, %s3723_s8 }
  0x2d   :  { %1209 = vrot.lane.b32.xlu0 %v3789_v6, %s3724_s9  ;;  %1211 = vrot.lane.b32.xlu1 %v3801_v8, %s3724_s9 }
  0x31   :  { %1213 = vrot.lane.b32.xlu0 %v3786_v5, %s3724_s9  ;;  %1215 = vrot.lane.b32.xlu1 %v3797_v7, %s3724_s9 }
  0x35   :  { %1412 = vrot.lane.b32.xlu0 %v3789_v6, %s3725_s10  ;;  %1414 = vrot.lane.b32.xlu1 %v3801_v8, %s3725_s10 }
  0x39   :  { %1416 = vrot.lane.b32.xlu0 %v3786_v5, %s3725_s10  ;;  %1418 = vrot.lane.b32.xlu1 %v3797_v7, %s3725_s10 }
  0x3d   :  { %1615 = vrot.lane.b32.xlu0 %v3789_v6, %s3726_s11  ;;  %1617 = vrot.lane.b32.xlu1 %v3801_v8, %s3726_s11 }
  0x41   :  { %1619 = vrot.lane.b32.xlu0 %v3786_v5, %s3726_s11  ;;  %1621 = vrot.lane.b32.xlu1 %v3797_v7, %s3726_s11 }
  0x77   :  { %v48_v17 = vpop.permute.xlu1 %47  ;;  %v44_v18 = vpop.permute.xlu0 %43 }
  0x7b   :  { %v50_v24 = vpop.permute.xlu1 %49  ;;  %v46_v25 = vpop.permute.xlu0 %45 }
  0x7c   :  { %v54_v27 = vsel %vm53_vm2, %v48_v17, %v50_v24  ;;  %v57_v28 = vsel %vm53_vm2, %v50_v24, %v44_v18  ;;  %v55_v29 = vsel %vm53_vm2, %v46_v25, %v48_v17  ;;  %v56_v30 = vsel %vm53_vm2, %v44_v18, %v46_v25 }
  0x7d   :  { %v80_v31 = vmul.f32 %v3881_v20, %v57_v28  ;;  %v82_v32 = vmul.f32 %v3884_v21, %v55_v29  ;;  %v81_v33 = vmul.f32 %v3887_v22, %v56_v30  ;;  %v83_v34 = vmul.f32 %v3890_v23, %v54_v27 }
  0x7e   :  { %v4005_v24 = vrot.slane %v3536_v61, %v3871_v15  ;;  %v4010_v25 = vrot.slane %v3536_v61, %v3867_v13  ;;  %v4013_v27 = vrot.slane %v3536_v61, %v3865_v12 }
  0x7f   :  { %3508 = vmatprep.subr.msk.mxu0 %vm89_vm3, %v81_v33  ;;  %3511 = vmatprep.subr.msk.mxu1 %vm89_vm3, %v83_v34  ;;  %v398_v36 = vpop.permute.xlu0 %397  ;;  %v400_v37 = vpop.permute.xlu1 %399 }
  0x80   :  { %3509 = vmatpush1.msk.msra.mxu0 %vm89_vm3, %v80_v31  ;;  %3512 = vmatpush1.msk.msra.mxu1 %vm89_vm3, %v82_v32  ;;  %v408_v38 = vsel %vm405_vm4, %v398_v36, %v400_v37 }
  0x81   :  { %3510 = vmatmul.mubr.msk.f32.vlgmr.msra.gmra.mrb[0].mxu0 %vm85_vm5, %v84_v35  ;;  %3513 = vmatmul.mubr.msk.f32.vlgmr.msra.gmra.mrb[0].mxu1 %vm85_vm5, %v84_v35  ;;  %v434_v39 = vmul.f32 %v3894_v26, %v408_v38 }
  0x82   :  { %3514 = vmatprep.subr.msk.mxu0 %vm89_vm3, %v3801_v8  ;;  %3517 = vmatprep.subr.msk.mxu1 %vm89_vm3, %v3797_v7  ;;  %v3991_v7 = vrot.slane %v3536_v61, %v3869_v14  ;;  %v3537_v61 = vld [vmem:[%s4467_s1 + $0x18] sm:$0xff] }
  0x83   :  { %v402_v44 = vpop.permute.xlu0 %401  ;;  %v404_v45 = vpop.permute.xlu1 %403  ;;  %3515 = vmatpush1.msk.msra.mxu0 %vm89_vm3, %v3789_v6  ;;  %319 = vmatprep.mubr.f32.mxu0 %v3718_v4 }
  0x84   :  { %v407_v46 = vsel %vm405_vm4, %v400_v37, %v402_v44  ;;  %v406_v47 = vsel %vm405_vm4, %v402_v44, %v404_v45  ;;  %v409_v48 = vsel %vm405_vm4, %v404_v45, %v398_v36  ;;  %3518 = vmatpush1.msk.msra.mxu1 %vm89_vm3, %v3786_v5  ;;  %390 = vmatprep.mubr.f32.mxu1 %v3718_v4  ;;  %v3529_v36 = vld [vmem:[%s4467_s1 + $0x10] sm:$0xff] }
  0x85   :  { %v436_v49 = vmul.f32 %v3921_v40, %v406_v47  ;;  %3522 = vmatprep.subr.msk.mxu0 %vm89_vm3, %v434_v39  ;;  %v435_v51 = vmul.f32 %v3924_v41, %v407_v46  ;;  %v433_v52 = vmul.f32 %v3927_v42, %v409_v48  ;;  %v3544_v37 = vld [vmem:[%s4472_s6 + $0x4] ss:$8 sm:$0xf] }
  0x86   :  { %v4038_v43 = vrot.slane %v3544_v37, %v3869_v14  ;;  %v4041_v44 = vrot.slane %v3544_v37, %v3871_v15  ;;  %v4044_v45 = vrot.slane %v3544_v37, %v3865_v12  ;;  %v4049_v46 = vrot.slane %v3544_v37, %v3867_v13 }
  0x87   :  { %v601_v54 = vpop.permute.xlu0 %600  ;;  %v603_v55 = vpop.permute.xlu1 %602  ;;  %3525 = vmatprep.subr.msk.mxu1 %vm89_vm3, %v436_v49 }
  0x88   :  { %v611_v56 = vsel %vm608_vm6, %v601_v54, %v603_v55 }
  0x89   :  { %3516 = vmatmul.mubr.msk.f32.vlgmr.msra.gmra.mrb[0].mxu0 %vm85_vm5, %v3507_v53  ;;  %3519 = vmatmul.mubr.msk.f32.vlgmr.msra.gmra.mrb[0].mxu1 %vm85_vm5, %v3507_v53  ;;  %v637_v57 = vmul.f32 %v3952_v50, %v611_v56 }
  0x8a   :  { %3523 = vmatpush1.msk.msra.mxu0 %vm89_vm3, %v433_v52  ;;  %3526 = vmatpush1.msk.msra.mxu1 %vm89_vm3, %v435_v51 }
  0x8b   :  { %v605_v62 = vpop.permute.xlu0 %604  ;;  %v607_v63 = vpop.permute.xlu1 %606  ;;  %518 = vmatprep.mubr.f32.mxu0 %v3718_v4  ;;  %589 = vmatprep.mubr.f32.mxu1 %v3718_v4 }
  0x8c   :  { %v610_v2 = vsel %vm608_vm6, %v603_v55, %v605_v62  ;;  %v609_v3 = vsel %vm608_vm6, %v605_v62, %v607_v63  ;;  %v612_v5 = vsel %vm608_vm6, %v607_v63, %v601_v54  ;;  %3530 = vmatprep.subr.msk.mxu0 %vm89_vm3, %v637_v57  ;;  %v3552_v62 = vld [vmem:[%s4472_s6 + $0x5] ss:$8 sm:$0xf] }
  0x8d   :  { %v639_v6 = vmul.f32 %v3966_v58, %v609_v3  ;;  %v638_v8 = vmul.f32 %v3971_v59, %v610_v2  ;;  %v636_v9 = vmul.f32 %v3974_v60, %v612_v5  ;;  %v4077_v3 = vrot.slane %v3552_v62, %v3869_v14 }
  0x8e   :  { %v4080_v5 = vrot.slane %v3552_v62, %v3871_v15 }
  0x8f   :  { %v804_v16 = vpop.permute.xlu0 %803  ;;  %v806_v17 = vpop.permute.xlu1 %805  ;;  %3533 = vmatprep.subr.msk.mxu1 %vm89_vm3, %v639_v6  ;;  %v4083_v6 = vrot.slane %v3552_v62, %v3865_v12 }
  0x90   :  { %v814_v18 = vsel %vm811_vm7, %v804_v16, %v806_v17 }
  0x91   :  { %3524 = vmatmul.mubr.msk.f32.vlgmr.msra.gmra.mrb[0].mxu0 %vm85_vm5, %v3521_v10  ;;  %3527 = vmatmul.mubr.msk.f32.vlgmr.msra.gmra.mrb[0].mxu1 %vm85_vm5, %v3521_v10  ;;  %v840_v19 = vmul.f32 %v3991_v7, %v814_v18 }
  0x92   :  { %3531 = vmatpush1.msk.msra.mxu0 %vm89_vm3, %v636_v9  ;;  %3534 = vmatpush1.msk.msra.mxu1 %vm89_vm3, %v638_v8  ;;  %v4087_v8 = vrot.slane %v3552_v62, %v3867_v13  ;;  %v3568_v62 = vld [vmem:[%s4472_s6 + $0x7] ss:$8 sm:$0xf] }
  0x93   :  { %v808_v28 = vpop.permute.xlu0 %807  ;;  %v810_v29 = vpop.permute.xlu1 %809  ;;  %721 = vmatprep.mubr.f32.mxu0 %v3718_v4  ;;  %792 = vmatprep.mubr.f32.mxu1 %v3718_v4 }
  0x94   :  { %v813_v30 = vsel %vm811_vm7, %v806_v17, %v808_v28  ;;  %v812_v31 = vsel %vm811_vm7, %v808_v28, %v810_v29  ;;  %v815_v32 = vsel %vm811_vm7, %v810_v29, %v804_v16  ;;  %3538 = vmatprep.subr.msk.mxu0 %vm89_vm3, %v840_v19 }
  0x95   :  { %v842_v33 = vmul.f32 %v4005_v24, %v812_v31  ;;  %v841_v34 = vmul.f32 %v4010_v25, %v813_v30  ;;  %v839_v35 = vmul.f32 %v4013_v27, %v815_v32  ;;  %v3545_v32 = vld [vmem:[%s4467_s1 + $0x28] sm:$0xff] }
  0x97   :  { %v1007_v38 = vpop.permute.xlu0 %1006  ;;  %v1009_v39 = vpop.permute.xlu1 %1008  ;;  %3541 = vmatprep.subr.msk.mxu1 %vm89_vm3, %v842_v33  ;;  %v3560_v33 = vld [vmem:[%s4472_s6 + $0x6] ss:$8 sm:$0xf] }
  0x98   :  { %v1017_v47 = vsel %vm1014_vm8, %v1007_v38, %v1009_v39  ;;  %v4119_v37 = vrot.slane %v3560_v33, %v3871_v15 }
  0x99   :  { %3532 = vmatmul.mubr.msk.f32.vlgmr.msra.gmra.mrb[0].mxu0 %vm85_vm5, %v3529_v36  ;;  %3535 = vmatmul.mubr.msk.f32.vlgmr.msra.gmra.mrb[0].mxu1 %vm85_vm5, %v3529_v36  ;;  %v1042_v56 = vmul.f32 %v4044_v45, %v1017_v47  ;;  %v4116_v36 = vrot.slane %v3560_v33, %v3869_v14 }
  0x9a   :  { %3539 = vmatpush1.msk.msra.mxu0 %vm89_vm3, %v839_v35  ;;  %3542 = vmatpush1.msk.msra.mxu1 %vm89_vm3, %v841_v34 }
  0x9b   :  { %v1011_v48 = vpop.permute.xlu0 %1010  ;;  %v1013_v49 = vpop.permute.xlu1 %1012  ;;  %924 = vmatprep.mubr.f32.mxu0 %v3718_v4  ;;  %995 = vmatprep.mubr.f32.mxu1 %v3718_v4 }
  0x9c   :  { %v1016_v51 = vsel %vm1014_vm8, %v1009_v39, %v1011_v48  ;;  %v1015_v52 = vsel %vm1014_vm8, %v1011_v48, %v1013_v49  ;;  %v1018_v53 = vsel %vm1014_vm8, %v1013_v49, %v1007_v38  ;;  %v4122_v38 = vrot.slane %v3560_v33, %v3865_v12 }
  0x9d   :  { %v1043_v54 = vmul.f32 %v4038_v43, %v1016_v51  ;;  %v1045_v55 = vmul.f32 %v4041_v44, %v1018_v53  ;;  %v1044_v57 = vmul.f32 %v4049_v46, %v1015_v52  ;;  %v4126_v39 = vrot.slane %v3560_v33, %v3867_v13  ;;  %v3569_v33 = vld [vmem:[%s4467_s1 + $0x40] sm:$0xff] }
  0x9f   :  { %3546 = vmatprep.subr.msk.mxu0 %vm89_vm3, %v1043_v54  ;;  %v1210_v63 = vpop.permute.xlu0 %1209  ;;  %v1212_v2 = vpop.permute.xlu1 %1211  ;;  %3549 = vmatprep.subr.msk.mxu1 %vm89_vm3, %v1045_v55 }
  0xa0   :  { %v1220_v9 = vsel %vm1217_vm9, %v1210_v63, %v1212_v2 }
  0xa1   :  { %3540 = vmatmul.mubr.msk.f32.vlgmr.msra.gmra.mrb[0].mxu0 %vm85_vm5, %v3537_v61  ;;  %3543 = vmatmul.mubr.msk.f32.vlgmr.msra.gmra.mrb[0].mxu1 %vm85_vm5, %v3537_v61  ;;  %v1245_v30 = vmul.f32 %v4083_v6, %v1220_v9  ;;  %v3553_v61 = vld [vmem:[%s4467_s1 + $0x30] sm:$0xff]  ;;  %v4155_v9 = vrot.slane %v3568_v62, %v3869_v14 }
  0xa2   :  { %3547 = vmatpush1.msk.msra.mxu0 %vm89_vm3, %v1042_v56  ;;  %3550 = vmatpush1.msk.msra.mxu1 %vm89_vm3, %v1044_v57 }
  0xa3   :  { %v1214_v10 = vpop.permute.xlu0 %1213  ;;  %v1216_v16 = vpop.permute.xlu1 %1215  ;;  %1127 = vmatprep.mubr.f32.mxu0 %v3718_v4  ;;  %1198 = vmatprep.mubr.f32.mxu1 %v3718_v4 }
  0xa4   :  { %v1219_v17 = vsel %vm1217_vm9, %v1212_v2, %v1214_v10  ;;  %v1218_v18 = vsel %vm1217_vm9, %v1214_v10, %v1216_v16  ;;  %v1221_v19 = vsel %vm1217_vm9, %v1216_v16, %v1210_v63  ;;  %v4158_v10 = vrot.slane %v3568_v62, %v3871_v15 }
  0xa5   :  { %v1246_v28 = vmul.f32 %v4077_v3, %v1219_v17  ;;  %v1248_v29 = vmul.f32 %v4080_v5, %v1221_v19  ;;  %v1247_v31 = vmul.f32 %v4087_v8, %v1218_v18  ;;  %v4161_v16 = vrot.slane %v3568_v62, %v3865_v12 }
  0xa6   :  { %v4165_v17 = vrot.slane %v3568_v62, %v3867_v13 }
  0xa7   :  { %3554 = vmatprep.subr.msk.mxu0 %vm89_vm3, %v1246_v28  ;;  %v1413_v34 = vpop.permute.xlu0 %1412  ;;  %v1415_v35 = vpop.permute.xlu1 %1414  ;;  %3557 = vmatprep.subr.msk.mxu1 %vm89_vm3, %v1248_v29 }
  0xa8   :  { %v1423_v47 = vsel %vm1420_vm10, %v1413_v34, %v1415_v35 }
  0xa9   :  { %3548 = vmatmul.mubr.msk.f32.vlgmr.msra.gmra.mrb[0].mxu0 %vm85_vm5, %v3545_v32  ;;  %3551 = vmatmul.mubr.msk.f32.vlgmr.msra.gmra.mrb[0].mxu1 %vm85_vm5, %v3545_v32  ;;  %v1448_v56 = vmul.f32 %v4122_v38, %v1423_v47  ;;  %v3561_v32 = vld [vmem:[%s4467_s1 + $0x38] sm:$0xff]  ;;  %v1838_v47 = vld [vmem:[%s4471_s5] sm:$0xff] }
  0xaa   :  { %3555 = vmatpush1.msk.msra.mxu0 %vm89_vm3, %v1245_v30  ;;  %3558 = vmatpush1.msk.msra.mxu1 %vm89_vm3, %v1247_v31 }
  0xab   :  { %v1417_v48 = vpop.permute.xlu0 %1416  ;;  %v1419_v49 = vpop.permute.xlu1 %1418  ;;  %1330 = vmatprep.mubr.f32.mxu0 %v3718_v4  ;;  %1401 = vmatprep.mubr.f32.mxu1 %v3718_v4 }
  0xac   :  { %v1422_v51 = vsel %vm1420_vm10, %v1415_v35, %v1417_v48  ;;  %v1421_v52 = vsel %vm1420_vm10, %v1417_v48, %v1419_v49  ;;  %v1424_v53 = vsel %vm1420_vm10, %v1419_v49, %v1413_v34  ;;  %v1847_v34 = vcombine.high %v3777_v1, %v3777_v1  ;;  %v1820_v48 = vld [vmem:[%s4468_s2 + $0x10] sm:$0xff]  ;;  %v1819_v49 = vld [vmem:[%s4468_s2 + $0x8] sm:$0xff] }
  0xad   :  { %v1449_v54 = vmul.f32 %v4116_v36, %v1422_v51  ;;  %v1451_v55 = vmul.f32 %v4119_v37, %v1424_v53  ;;  %v1450_v57 = vmul.f32 %v4126_v39, %v1421_v52  ;;  %v1848_v35 = vcombine.high %v3772_v0, %v3772_v0 }
  0xaf   :  { %3562 = vmatprep.subr.msk.mxu0 %vm89_vm3, %v1449_v54  ;;  %v1616_v63 = vpop.permute.xlu0 %1615  ;;  %v1618_v2 = vpop.permute.xlu1 %1617  ;;  %3565 = vmatprep.subr.msk.mxu1 %vm89_vm3, %v1451_v55 }
  0xb0   :  { %v1626_v18 = vsel %vm1623_vm11, %v1616_v63, %v1618_v2 }
  0xb1   :  { %3556 = vmatmul.mubr.msk.f32.vlgmr.msra.gmra.mrb[0].mxu0 %vm85_vm5, %v3553_v61  ;;  %3559 = vmatmul.mubr.msk.f32.vlgmr.msra.gmra.mrb[0].mxu1 %vm85_vm5, %v3553_v61  ;;  %v1651_v30 = vmul.f32 %v4161_v16, %v1626_v18 }
  0xb2   :  { %3563 = vmatpush1.msk.msra.mxu0 %vm89_vm3, %v1448_v56  ;;  %3566 = vmatpush1.msk.msra.mxu1 %vm89_vm3, %v1450_v57 }
  0xb3   :  { %v1620_v19 = vpop.permute.xlu0 %1619  ;;  %v1622_v28 = vpop.permute.xlu1 %1621  ;;  %1533 = vmatprep.mubr.f32.mxu0 %v3718_v4  ;;  %1604 = vmatprep.mubr.f32.mxu1 %v3718_v4 }
  0xb4   :  { %v1625_v12 = vsel %vm1623_vm11, %v1618_v2, %v1620_v19  ;;  %v1624_v14 = vsel %vm1623_vm11, %v1620_v19, %v1622_v28  ;;  %v1627_v13 = vsel %vm1623_vm11, %v1622_v28, %v1616_v63 }
  0xb5   :  { %v1652_v15 = vmul.f32 %v4155_v9, %v1625_v12  ;;  %v1654_v29 = vmul.f32 %v4158_v10, %v1627_v13  ;;  %v1653_v31 = vmul.f32 %v4165_v17, %v1624_v14  ;;  %v1839_v13 = vld [vmem:[%s4470_s4] sm:$0xff] }
  0xb7   :  { %3570 = vmatprep.subr.msk.mxu0 %vm89_vm3, %v1652_v15  ;;  %3573 = vmatprep.subr.msk.mxu1 %vm89_vm3, %v1654_v29  ;;  %v3727_v15 = vmov 0  }
  0xb8   :  { %3691 = vset.pattern.permute.xlu0 %v3727_v15 }
  0xb9   :  { %3564 = vmatmul.mubr.msk.f32.vlgmr.msra.gmra.mrb[0].mxu0 %vm85_vm5, %v3561_v32  ;;  %3567 = vmatmul.mubr.msk.f32.vlgmr.msra.gmra.mrb[0].mxu1 %vm85_vm5, %v3561_v32 }
  0xba   :  { %3571 = vmatpush1.msk.msra.mxu0 %vm89_vm3, %v1651_v30  ;;  %3574 = vmatpush1.msk.msra.mxu1 %vm89_vm3, %v1653_v31 }
  0xbb   :  { %1736 = vmatprep.mubr.f32.mxu0 %v3718_v4  ;;  %1807 = vmatprep.mubr.f32.mxu1 %v3718_v4 }
  0xbc   :  { %3576 = vmatprep.subr.msk.mxu0 %vm89_vm3, %v1847_v34  ;;  %3579 = vmatprep.subr.msk.mxu1 %vm89_vm3, %v1848_v35 }
  0xc1   :  { %3572 = vmatmul.mubr.msk.f32.vlgmr.msra.gmra.mrb[0].mxu0 %vm85_vm5, %v3569_v33  ;;  %3575 = vmatmul.mubr.msk.f32.vlgmr.msra.gmra.mrb[0].mxu1 %vm85_vm5, %v3569_v33 }
  0xc2   :  { %1924 = vmatprep.mubr.f32.mxu0 %v3718_v4  ;;  %1995 = vmatprep.mubr.f32.mxu1 %v3718_v4 }
  0xc3   :  { %3577 = vmatpush1.msk.msra.mxu0 %vm89_vm3, %v3777_v1  ;;  %3580 = vmatpush1.msk.msra.mxu1 %vm89_vm3, %v3772_v0  ;;  %v1818_v1 = vld [vmem:[%s4468_s2] sm:$0xff]  ;;  %v1821_v0 = vld [vmem:[%s4468_s2 + $0x18] sm:$0xff] }
  0xc5   :  { %3578 = vmatmul.mubr.msk.f32.vlgmr.msra.gmra.mrb[2].mxu0 %vm85_vm5, %v1838_v47  ;;  %3581 = vmatmul.mubr.msk.f32.vlgmr.msra.gmra.mrb[2].mxu1 %vm85_vm5, %v1838_v47 }
  0xc6   :  { %2089 = vmatprep.mubr.f32.mxu0 %v3718_v4  ;;  %2160 = vmatprep.mubr.f32.mxu1 %v3718_v4 }
 0x194   :  { %v1738_v51 = vpop.f32.mrb[0].mxu0  ;;  %v1809_v52 = vpop.f32.mrb[0].mxu1 }
 0x195   :  { %v1822_v53 = vadd.f32 %v1818_v1, %v1738_v51  ;;  %v1824_v54 = vadd.f32 %v1820_v48, %v1809_v52  ;;  %v1740_v55 = vpop.f32.mrb[1].mxu0  ;;  %v1811_v56 = vpop.f32.mrb[1].mxu1 }
 0x196   :  { %v1823_v57 = vadd.f32 %v1819_v49, %v1740_v55  ;;  %v1825_v61 = vadd.f32 %v1821_v0, %v1811_v56 }
 0x197   :  { %vm1826_vm12 = vcmp.gt.f32.partialorder %v1822_v53, 0.0  ;;  %v1830_v62 = vmul.f32 0.2, %v1822_v53  ;;  %v1832_v18 = vmul.f32 0.2, %v1824_v54  ;;  %vm1828_vm14 = vcmp.gt.f32.partialorder %v1824_v54, 0.0 }
 0x198   :  { %vm1827_vm13 = vcmp.gt.f32.partialorder %v1823_v57, 0.0  ;;  %v1831_v63 = vmul.f32 0.2, %v1823_v57  ;;  %v1833_v28 = vmul.f32 0.2, %v1825_v61  ;;  %vm1829_vm15 = vcmp.gt.f32.partialorder %v1825_v61, 0.0 }
 0x199   :  { %v4229_v2 = vsel %vm1826_vm12, %v1822_v53, %v1830_v62  ;;  %v4237_v12 = vsel %vm1828_vm14, %v1824_v54, %v1832_v18 }
 0x19a   :  { %v4231_v19 = vsel %vm1827_vm13, %v1823_v57, %v1831_v63  ;;  %2004 = vrot.lane.b32.xlu0 %v4229_v2, %s3719_s0  ;;  %v1837_v14 = vsel %vm1829_vm15, %v1825_v61, %v1833_v28  ;;  %v3582_v61 = vld [vmem:[%s4469_s3 + $0x20] sm:$0xff] }
 0x19b   :  { %2006 = vrot.lane.b32.xlu1 %v4231_v19, %s3719_s0 }
 0x19e   :  { %2008 = vrot.lane.b32.xlu0 %v4237_v12, %s3719_s0 }
 0x19f   :  { %2010 = vrot.lane.b32.xlu1 %v1837_v14, %s3719_s0 }
 0x1a2   :  { %2312 = vrot.lane.b32.xlu0 %v4229_v2, %s3720_s28 }
 0x1a3   :  { %2314 = vrot.lane.b32.xlu1 %v4231_v19, %s3720_s28 }
 0x1a6   :  { %2316 = vrot.lane.b32.xlu0 %v4237_v12, %s3720_s28 }
 0x1a7   :  { %2318 = vrot.lane.b32.xlu1 %v1837_v14, %s3720_s28 }
 0x1aa   :  { %2479 = vrot.lane.b32.xlu0 %v4229_v2, %s3721_s29 }
 0x1ab   :  { %2481 = vrot.lane.b32.xlu1 %v4231_v19, %s3721_s29 }
 0x1ae   :  { %2483 = vrot.lane.b32.xlu0 %v4237_v12, %s3721_s29 }
 0x1af   :  { %2485 = vrot.lane.b32.xlu1 %v1837_v14, %s3721_s29 }
 0x1b2   :  { %2646 = vrot.lane.b32.xlu0 %v4229_v2, %s3722_s30 }
 0x1b3   :  { %2648 = vrot.lane.b32.xlu1 %v4231_v19, %s3722_s30 }
 0x1b6   :  { %2650 = vrot.lane.b32.xlu0 %v4237_v12, %s3722_s30 }
 0x1b7   :  { %2652 = vrot.lane.b32.xlu1 %v1837_v14, %s3722_s30 }
 0x1ba   :  { %2813 = vrot.lane.b32.xlu0 %v4229_v2, %s3723_s8 }
 0x1bb   :  { %2815 = vrot.lane.b32.xlu1 %v4231_v19, %s3723_s8 }
 0x1be   :  { %2817 = vrot.lane.b32.xlu0 %v4237_v12, %s3723_s8 }
 0x1bf   :  { %2819 = vrot.lane.b32.xlu1 %v1837_v14, %s3723_s8 }
 0x1c2   :  { %2980 = vrot.lane.b32.xlu0 %v4229_v2, %s3724_s9 }
 0x1c3   :  { %2982 = vrot.lane.b32.xlu1 %v4231_v19, %s3724_s9 }
 0x1c6   :  { %2984 = vrot.lane.b32.xlu0 %v4237_v12, %s3724_s9 }
 0x1c7   :  { %2986 = vrot.lane.b32.xlu1 %v1837_v14, %s3724_s9 }
 0x1ca   :  { %3147 = vrot.lane.b32.xlu0 %v4229_v2, %s3725_s10 }
 0x1cb   :  { %3149 = vrot.lane.b32.xlu1 %v4231_v19, %s3725_s10 }
 0x1ce   :  { %3151 = vrot.lane.b32.xlu0 %v4237_v12, %s3725_s10 }
 0x1cf   :  { %3153 = vrot.lane.b32.xlu1 %v1837_v14, %s3725_s10 }
 0x1d2   :  { %3314 = vrot.lane.b32.xlu0 %v4229_v2, %s3726_s11 }
 0x1d3   :  { %3316 = vrot.lane.b32.xlu1 %v4231_v19, %s3726_s11 }
 0x1d6   :  { %3318 = vrot.lane.b32.xlu0 %v4237_v12, %s3726_s11 }
 0x1d7   :  { %3320 = vrot.lane.b32.xlu1 %v1837_v14, %s3726_s11 }
 0x1da   :  { %1842 = vperm.xlu0 %3691, %v1839_v13   ;;  %v3587_v13 = vld [vmem:[%s4469_s3 + $0x8] sm:$0xff] }
 0x20c   :  { %v2005_v29 = vpop.permute.xlu0 %2004 }
 0x20d   :  { %v2007_v30 = vpop.permute.xlu1 %2006 }
 0x20e   :  { %v2014_v31 = vsel %vm53_vm2, %v2005_v29, %v2007_v30 }
 0x20f   :  { %v2017_v32 = vmul.f32 %v2014_v31, %v3887_v22  ;;  %v2020_v22 = vld [vmem:[%s4469_s3] sm:$0xff] }
 0x210   :  { %v2009_v33 = vpop.permute.xlu0 %2008 }
 0x211   :  { %v2013_v34 = vsel %vm53_vm2, %v2007_v30, %v2009_v33  ;;  %2025 = vmatprep.subr.mxu0 %v2017_v32  ;;  %v2011_v35 = vpop.permute.xlu1 %2010 }
 0x212   :  { %v2012_v47 = vsel %vm53_vm2, %v2009_v33, %v2011_v35  ;;  %v2015_v1 = vsel %vm53_vm2, %v2011_v35, %v2005_v29  ;;  %v2018_v0 = vmul.f32 %v2013_v34, %v3884_v21 }
 0x213   :  { %v2016_v48 = vmul.f32 %v2015_v1, %v3881_v20  ;;  %v2019_v49 = vmul.f32 %v2012_v47, %v3890_v23  ;;  %v3590_v47 = vld [vmem:[%s4469_s3 + $0x10] sm:$0xff] }
 0x214   :  { %v2313_v51 = vpop.permute.xlu0 %2312 }
 0x215   :  { %2026 = vmatpush1.msra.mxu0 %v2016_v48  ;;  %2096 = vmatprep.subr.mxu1 %v2019_v49  ;;  %v2315_v52 = vpop.permute.xlu1 %2314 }
 0x216   :  { %v2322_v53 = vsel %vm405_vm4, %v2313_v51, %v2315_v52  ;;  %3583 = vmatmul.mubr.msk.f32.vlgmr.msra.gmra.mrb[2].mxu0 %vm2021_vm0, %v2020_v22  ;;  %2097 = vmatpush1.msra.mxu1 %v2018_v0 }
 0x217   :  { %v2325_v20 = vmul.f32 %v2322_v53, %v3894_v26  ;;  %2170 = vmatprep.subr.mxu0 %v4231_v19  ;;  %3584 = vmatmul.mubr.msk.f32.vlgmr.msra.gmra.mrb[2].mxu1 %vm2021_vm0, %v2020_v22 }
 0x218   :  { %2171 = vmatpush1.msra.mxu0 %v4229_v2  ;;  %2241 = vmatprep.subr.mxu1 %v1837_v14  ;;  %v2317_v21 = vpop.permute.xlu0 %2316 }
 0x219   :  { %2242 = vmatpush1.msra.mxu1 %v4237_v12  ;;  %2333 = vmatprep.subr.mxu0 %v2325_v20  ;;  %v2319_v23 = vpop.permute.xlu1 %2318  ;;  %v2321_v26 = vsel %vm405_vm4, %v2315_v52, %v2317_v21  ;;  %v3593_v20 = vld [vmem:[%s4469_s3 + $0x18] sm:$0xff] }
 0x21a   :  { %v2320_v54 = vsel %vm405_vm4, %v2317_v21, %v2319_v23  ;;  %v2323_v55 = vsel %vm405_vm4, %v2319_v23, %v2313_v51  ;;  %2234 = vmatprep.mubr.f32.mxu0 %v3718_v4  ;;  %2305 = vmatprep.mubr.f32.mxu1 %v3718_v4  ;;  %v2326_v2 = vmul.f32 %v2321_v26, %v3924_v41 }
 0x21b   :  { %v2324_v56 = vmul.f32 %v2323_v55, %v3927_v42  ;;  %v2327_v57 = vmul.f32 %v2320_v54, %v3921_v40 }
 0x21c   :  { %v2480_v62 = vpop.permute.xlu0 %2479 }
 0x21d   :  { %2404 = vmatprep.subr.mxu1 %v2327_v57  ;;  %v2482_v63 = vpop.permute.xlu1 %2481 }
 0x21e   :  { %v2489_v18 = vsel %vm608_vm6, %v2480_v62, %v2482_v63  ;;  %3585 = vmatmul.mubr.msk.f32.vlgmr.msra.gmra.mrb[2].mxu0 %vm2021_vm0, %v3582_v61 }
 0x21f   :  { %v2492_v19 = vmul.f32 %v2489_v18, %v3952_v50  ;;  %2334 = vmatpush1.msra.mxu0 %v2324_v56  ;;  %3586 = vmatmul.mubr.msk.f32.vlgmr.msra.gmra.mrb[2].mxu1 %vm2021_vm0, %v3582_v61 }
 0x220   :  { %2405 = vmatpush1.msra.mxu1 %v2326_v2  ;;  %v2484_v40 = vpop.permute.xlu0 %2483  ;;  %2397 = vmatprep.mubr.f32.mxu0 %v3718_v4 }
 0x221   :  { %2500 = vmatprep.subr.mxu0 %v2492_v19  ;;  %v2486_v42 = vpop.permute.xlu1 %2485  ;;  %2468 = vmatprep.mubr.f32.mxu1 %v3718_v4  ;;  %v2488_v50 = vsel %vm608_vm6, %v2482_v63, %v2484_v40 }
 0x222   :  { %v2487_v41 = vsel %vm608_vm6, %v2484_v40, %v2486_v42  ;;  %v2490_v28 = vsel %vm608_vm6, %v2486_v42, %v2480_v62  ;;  %v2493_v30 = vmul.f32 %v2488_v50, %v3971_v59  ;;  %v3596_v62 = vld [vmem:[%s4469_s3 + $0x28] sm:$0xff]  ;;  %v3599_v50 = vld [vmem:[%s4469_s3 + $0x30] sm:$0xff] }
 0x223   :  { %v2491_v12 = vmul.f32 %v2490_v28, %v3974_v60  ;;  %v2494_v14 = vmul.f32 %v2487_v41, %v3966_v58 }
 0x224   :  { %v2647_v15 = vpop.permute.xlu0 %2646 }
 0x225   :  { %2571 = vmatprep.subr.mxu1 %v2494_v14  ;;  %v2649_v29 = vpop.permute.xlu1 %2648 }
 0x226   :  { %v2656_v31 = vsel %vm811_vm7, %v2647_v15, %v2649_v29  ;;  %3588 = vmatmul.mubr.msk.f32.vlgmr.msra.gmra.mrb[2].mxu0 %vm2021_vm0, %v3587_v13 }
 0x227   :  { %v2659_v32 = vmul.f32 %v2656_v31, %v3991_v7  ;;  %2501 = vmatpush1.msra.mxu0 %v2491_v12  ;;  %3589 = vmatmul.mubr.msk.f32.vlgmr.msra.gmra.mrb[2].mxu1 %vm2021_vm0, %v3587_v13 }
 0x228   :  { %2572 = vmatpush1.msra.mxu1 %v2493_v30  ;;  %v2651_v58 = vpop.permute.xlu0 %2650  ;;  %2564 = vmatprep.mubr.f32.mxu0 %v3718_v4 }
 0x229   :  { %2667 = vmatprep.subr.mxu0 %v2659_v32  ;;  %v2653_v60 = vpop.permute.xlu1 %2652  ;;  %2635 = vmatprep.mubr.f32.mxu1 %v3718_v4  ;;  %v2655_v7 = vsel %vm811_vm7, %v2649_v29, %v2651_v58 }
 0x22a   :  { %v2654_v59 = vsel %vm811_vm7, %v2651_v58, %v2653_v60  ;;  %v2657_v33 = vsel %vm811_vm7, %v2653_v60, %v2647_v15  ;;  %v2660_v49 = vmul.f32 %v2655_v7, %v4010_v25  ;;  %v3602_v58 = vld [vmem:[%s4469_s3 + $0x38] sm:$0xff]  ;;  %s3694_s3 = scalar_lea.vmem %s3500_s14, 512 }
 0x22b   :  { %v2658_v34 = vmul.f32 %v2657_v33, %v4013_v27  ;;  %v2661_v35 = vmul.f32 %v2654_v59, %v4005_v24  ;;  %p3695_p0 = scmp.ne.s32.totalorder %s3500_s14, %s3694_s3  ;;  %p3700_p2 = scmp.lt.s32.totalorder %s3694_s3, %s3694_s3 }
 0x22c   :  { %v2814_v1 = vpop.permute.xlu0 %2813 }
 0x22d   :  { %2738 = vmatprep.subr.mxu1 %v2661_v35  ;;  %v2816_v48 = vpop.permute.xlu1 %2815  ;;  %p3701_p3 = por %p3700_p2, %p3699_p1 }
 0x22e   :  { %3591 = vmatmul.mubr.msk.f32.vlgmr.msra.gmra.mrb[2].mxu0 %vm2021_vm0, %v3590_v47  ;;  %v2823_v0 = vsel %vm1014_vm8, %v2814_v1, %v2816_v48 }
 0x22f   :  { %2668 = vmatpush1.msra.mxu0 %v2658_v34  ;;  %3592 = vmatmul.mubr.msk.f32.vlgmr.msra.gmra.mrb[2].mxu1 %vm2021_vm0, %v3590_v47  ;;  %v2825_v23 = vmul.f32 %v2823_v0, %v4044_v45  ;;  %p3702_p4 = pnand %p3701_p3, %p3695_p0 }
 0x230   :  { %2739 = vmatpush1.msra.mxu1 %v2660_v49  ;;  %v2818_v22 = vpop.permute.xlu0 %2817  ;;  %2731 = vmatprep.mubr.f32.mxu0 %v3718_v4 }
 0x231   :  { %v2822_v24 = vsel %vm1014_vm8, %v2816_v48, %v2818_v22  ;;  %v2820_v27 = vpop.permute.xlu1 %2819  ;;  %2802 = vmatprep.mubr.f32.mxu1 %v3718_v4 }
 0x232   :  { %v2826_v25 = vmul.f32 %v2822_v24, %v4038_v43  ;;  %v2824_v51 = vsel %vm1014_vm8, %v2820_v27, %v2814_v1  ;;  %v2821_v52 = vsel %vm1014_vm8, %v2818_v22, %v2820_v27 }
 0x233   :  { %v2828_v53 = vmul.f32 %v2824_v51, %v4041_v44  ;;  %v2827_v43 = vmul.f32 %v2821_v52, %v4049_v46 }
 0x234   :  { %v2981_v21 = vpop.permute.xlu0 %2980  ;;  %2834 = vmatprep.subr.mxu0 %v2826_v25 }
 0x235   :  { %2905 = vmatprep.subr.mxu1 %v2828_v53  ;;  %v2983_v54 = vpop.permute.xlu1 %2982 }
 0x236   :  { %3594 = vmatmul.mubr.msk.f32.vlgmr.msra.gmra.mrb[2].mxu0 %vm2021_vm0, %v3593_v20  ;;  %v2990_v45 = vsel %vm1217_vm9, %v2981_v21, %v2983_v54 }
 0x237   :  { %2835 = vmatpush1.msra.mxu0 %v2825_v23  ;;  %3595 = vmatmul.mubr.msk.f32.vlgmr.msra.gmra.mrb[2].mxu1 %vm2021_vm0, %v3593_v20  ;;  %v2992_v2 = vmul.f32 %v2990_v45, %v4083_v6 }
 0x238   :  { %2906 = vmatpush1.msra.mxu1 %v2827_v43  ;;  %v2985_v55 = vpop.permute.xlu0 %2984  ;;  %2898 = vmatprep.mubr.f32.mxu0 %v3718_v4 }
 0x239   :  { %v2989_v44 = vsel %vm1217_vm9, %v2983_v54, %v2985_v55  ;;  %v2987_v26 = vpop.permute.xlu1 %2986  ;;  %2969 = vmatprep.mubr.f32.mxu1 %v3718_v4 }
 0x23a   :  { %v2993_v46 = vmul.f32 %v2989_v44, %v4077_v3  ;;  %v2991_v56 = vsel %vm1217_vm9, %v2987_v26, %v2981_v21  ;;  %v2988_v57 = vsel %vm1217_vm9, %v2985_v55, %v2987_v26 }
 0x23b   :  { %v2995_v61 = vmul.f32 %v2991_v56, %v4080_v5  ;;  %v2994_v3 = vmul.f32 %v2988_v57, %v4087_v8 }
 0x23c   :  { %v3148_v63 = vpop.permute.xlu0 %3147  ;;  %3001 = vmatprep.subr.mxu0 %v2993_v46 }
 0x23d   :  { %3072 = vmatprep.subr.mxu1 %v2995_v61  ;;  %v3150_v18 = vpop.permute.xlu1 %3149 }
 0x23e   :  { %3597 = vmatmul.mubr.msk.f32.vlgmr.msra.gmra.mrb[2].mxu0 %vm2021_vm0, %v3596_v62  ;;  %v3157_v6 = vsel %vm1420_vm10, %v3148_v63, %v3150_v18 }
 0x23f   :  { %3002 = vmatpush1.msra.mxu0 %v2992_v2  ;;  %3598 = vmatmul.mubr.msk.f32.vlgmr.msra.gmra.mrb[2].mxu1 %vm2021_vm0, %v3596_v62  ;;  %v3159_v14 = vmul.f32 %v3157_v6, %v4122_v38 }
 0x240   :  { %3073 = vmatpush1.msra.mxu1 %v2994_v3  ;;  %v3152_v19 = vpop.permute.xlu0 %3151  ;;  %3065 = vmatprep.mubr.f32.mxu0 %v3718_v4 }
 0x241   :  { %v3156_v5 = vsel %vm1420_vm10, %v3150_v18, %v3152_v19  ;;  %v3154_v40 = vpop.permute.xlu1 %3153  ;;  %3136 = vmatprep.mubr.f32.mxu1 %v3718_v4 }
 0x242   :  { %v3160_v8 = vmul.f32 %v3156_v5, %v4116_v36  ;;  %v3158_v42 = vsel %vm1420_vm10, %v3154_v40, %v3148_v63  ;;  %v3155_v41 = vsel %vm1420_vm10, %v3152_v19, %v3154_v40 }
 0x243   :  { %v3162_v28 = vmul.f32 %v3158_v42, %v4119_v37  ;;  %v3161_v36 = vmul.f32 %v3155_v41, %v4126_v39 }
 0x244   :  { %v3315_v12 = vpop.permute.xlu0 %3314  ;;  %3168 = vmatprep.subr.mxu0 %v3160_v8 }
 0x245   :  { %3239 = vmatprep.subr.mxu1 %v3162_v28  ;;  %v3317_v13 = vpop.permute.xlu1 %3316 }
 0x246   :  { %3600 = vmatmul.mubr.msk.f32.vlgmr.msra.gmra.mrb[2].mxu0 %vm2021_vm0, %v3599_v50  ;;  %v3324_v38 = vsel %vm1623_vm11, %v3315_v12, %v3317_v13 }
 0x247   :  { %3169 = vmatpush1.msra.mxu0 %v3159_v14  ;;  %3601 = vmatmul.mubr.msk.f32.vlgmr.msra.gmra.mrb[2].mxu1 %vm2021_vm0, %v3599_v50  ;;  %v3326_v60 = vmul.f32 %v3324_v38, %v4161_v16 }
 0x248   :  { %3240 = vmatpush1.msra.mxu1 %v3161_v36  ;;  %v3319_v15 = vpop.permute.xlu0 %3318  ;;  %3232 = vmatprep.mubr.f32.mxu0 %v3718_v4 }
 0x249   :  { %v3323_v37 = vsel %vm1623_vm11, %v3317_v13, %v3319_v15  ;;  %v3321_v29 = vpop.permute.xlu1 %3320  ;;  %3303 = vmatprep.mubr.f32.mxu1 %v3718_v4 }
 0x24a   :  { %v3327_v39 = vmul.f32 %v3323_v37, %v4155_v9  ;;  %v3325_v30 = vsel %vm1623_vm11, %v3321_v29, %v3315_v12  ;;  %v3322_v31 = vsel %vm1623_vm11, %v3319_v15, %v3321_v29 }
 0x24b   :  { %v3329_v32 = vmul.f32 %v3325_v30, %v4158_v10  ;;  %v3328_v59 = vmul.f32 %v3322_v31, %v4165_v17 }
 0x24c   :  { %3335 = vmatprep.subr.mxu0 %v3327_v39 }
 0x24d   :  { %3406 = vmatprep.subr.mxu1 %v3329_v32 }
 0x24e   :  { %3603 = vmatmul.mubr.msk.f32.vlgmr.msra.gmra.mrb[2].mxu0 %vm2021_vm0, %v3602_v58 }
 0x24f   :  { %3336 = vmatpush1.msra.mxu0 %v3326_v60  ;;  %3604 = vmatmul.mubr.msk.f32.vlgmr.msra.gmra.mrb[2].mxu1 %vm2021_vm0, %v3602_v58 }
 0x250   :  { %3407 = vmatpush1.msra.mxu1 %v3328_v59  ;;  %3399 = vmatprep.mubr.f32.mxu0 %v3718_v4 }
 0x251   :  { %3470 = vmatprep.mubr.f32.mxu1 %v3718_v4 }
 0x256   :  { %3606 = vmatmul.mubr.msk.f32.vlgmr.msra.gmra.mrb[2].mxu0 %vm2021_vm0, %v3605_v11 }
 0x257   :  { %3607 = vmatmul.mubr.msk.f32.vlgmr.msra.gmra.mrb[2].mxu1 %vm2021_vm0, %v3605_v11 }
 0x259   :  { %v1843_v9 = vpop.permute.xlu0 %1842 }
 0x329   :  { %v3401_v10 = vpop.f32.mrb[2].mxu0 }
 0x32a   :  { %v3608_v16 = vadd.f32 %v3401_v10, %v1843_v9  ;;  %v3403_v17 = vpop.f32.mrb[3].mxu0  ;;  %v3472_v33 = vpop.f32.mrb[2].mxu1 }
 0x32b   :  { %v3609_v7 = vadd.f32 %v3403_v17, %v1843_v9  ;;  %v3610_v34 = vadd.f32 %v3472_v33, %v1843_v9  ;;  %v3474_v35 = vpop.f32.mrb[3].mxu1 }
 0x32c   :  { %v3485_v47 = vmul.f32 0.70710677, %v3608_v16  ;;  %v3611_v4 = vadd.f32 %v3474_v35, %v1843_v9 }
 0x32d   :  { %v3486_v1 = vmul.f32 0.70710677, %v3609_v7  ;;  %v3487_v48 = vmul.f32 0.70710677, %v3610_v34 }
 0x32e   :  { %3489 = vst [vmem:[#allocation2] sm:$0xff] %v3485_v47  ;;  %v3488_v49 = vmul.f32 0.70710677, %v3611_v4 }
 0x32f   :  { %3490 = vst [vmem:[#allocation2 + $0x8] sm:$0xff] %v3486_v1  ;;  %3491 = vst [vmem:[#allocation2 + $0x10] sm:$0xff] %v3487_v48 }
 0x330   :  { %3492 = vst [vmem:[#allocation2 + $0x18] sm:$0xff] %v3488_v49 }
 0x331   :  { %3705 = shalt.err (!%p3702_p4)
}
 0x332   :  { %s3706_s17 = scalar_lea.hbm %s4473_s7, 512 }
 0x333   :  { %p3707_p5 = scmp.ne.s32.totalorder %s4473_s7, %s3706_s17  ;;  %p3710_p6 = scmp.lt.u32.totalorder %s3706_s17, %s4473_s7 }
 0x335   :  { %p3712_p7 = pnand %p3710_p6, %p3707_p5 }
 0x337   :  { %3715 = shalt.err (!%p3712_p7)
}
 0x338   :  { %3502 = dma.vmem_to_hbm [thread:$0]  %s3500_s14, 512, %s4473_s7, [#allocation3]  }
 0x339   :  { %3716 = dma.done.wait [#allocation3], 512  }
 0x33a   :  { %3717 = vsyncadd [#allocation3], 4294966784 }
 0x33b   :  { %3506 = vsyncpa [#allocation3], 1 }

</bundles_post_ra>
